<compile_context>
chip_gen: v6e
topology: v6e:2x2x1
jax: 0.10.0
libtpu: 0.0.40
codegen_flags: <defaults>
</compile_context>

<pallas_src>
import functools

import jax
import jax.numpy as jnp
import numpy as np
from jax.experimental import pallas as pl
from jax.experimental.pallas import tpu as pltpu


def _fourier_mixer_kernel(x_ref, ch_ref, sh_ref, cs_ref, ss_ref, o_ref, *,
                          fuse_stages):
    """One grid step: real part of the 2-D ortho FFT of a (Bt, S, H) batch tile.

    x_ref : (Bt, S, H) input tile in its ORIGINAL dtype (cast to bf16 in-kernel).
    ch/sh : (H, H) cos / -sin ortho DFT matrices (Re / Im of F_H, hidden dim).
    cs/ss : (S, S) cos / +sin ortho DFT matrices (sequence dim; +sin so stage 2
            is a pure sum of dots).
    o_ref : (Bt, S, H) output tile in the original dtype.
    """
    Bt, S, H = x_ref.shape
    cdtype = ch_ref.dtype  # compute dtype for MXU operands (bf16)

    ch = ch_ref[...]
    sh = sh_ref[...]
    cs = cs_ref[...]
    ss = ss_ref[...]

    if fuse_stages:
        # Large-tile path (S >= 256 already fills the MXU rows): fuse both FFT
        # stages per batch element so live f32/bf16 intermediates are ~S*H*12
        # bytes instead of ~Bt*S*H*12 bytes (matters on v7x's 64 MiB VMEM).
        for b in range(Bt):
            xb = x_ref[b].astype(cdtype)                       # in-kernel cast (VPU)
            y_re = jnp.dot(xb, ch,
                           preferred_element_type=jnp.float32).astype(cdtype)
            y_im = jnp.dot(xb, sh,
                           preferred_element_type=jnp.float32).astype(cdtype)
            z = (jnp.dot(cs, y_re, preferred_element_type=jnp.float32)
                 + jnp.dot(ss, y_im, preferred_element_type=jnp.float32))
            o_ref[b] = z.astype(o_ref.dtype)
    else:
        # Small/medium-tile path: collapse (Bt, S) -> Bt*S rows so stage 1 is a
        # single tall MXU matmul (long M dim amortizes per-step overhead).
        x2 = x_ref[...].astype(cdtype).reshape(Bt * S, H)      # in-kernel cast (VPU)
        y_re = jnp.dot(x2, ch,
                       preferred_element_type=jnp.float32).astype(cdtype)
        y_im = jnp.dot(x2, sh,
                       preferred_element_type=jnp.float32).astype(cdtype)
        # Stage 2 -- FFT along the sequence dim, real part only:
        #   Re(F_S @ Y) = C_S @ Re(Y) + Sin_S @ Im(Y)    (sum of dots -> MXU acc)
        for b in range(Bt):
            yr = y_re[b * S:(b + 1) * S, :]
            yi = y_im[b * S:(b + 1) * S, :]
            z = (jnp.dot(cs, yr, preferred_element_type=jnp.float32)
                 + jnp.dot(ss, yi, preferred_element_type=jnp.float32))
            o_ref[b] = z.astype(o_ref.dtype)


@functools.lru_cache(maxsize=None)
def _dft_mats(n, dtype_name, sin_sign):
    """Ortho-normalized DFT matrix split into (cos, sin_sign*sin) parts.

    Built host-side in float64; the phase j*k is reduced mod n in exact integer
    arithmetic so entries stay accurate for large n. Cached per (n, dtype, sign).
    """
    idx = np.arange(n, dtype=np.int64)
    phase = 2.0 * np.pi * ((np.outer(idx, idx) % n).astype(np.float64)) / n
    scale = 1.0 / np.sqrt(float(n))
    cos_m = np.cos(phase) * scale
    sin_m = float(sin_sign) * np.sin(phase) * scale
    return (jnp.asarray(cos_m, dtype=dtype_name),
            jnp.asarray(sin_m, dtype=dtype_name))


def _vmem_capacity_bytes():
    """Generation-aware VMEM capacity (128 MiB v5e/v6e, 64 MiB per TC on v7x)."""
    try:
        return int(pltpu.get_tpu_info().vmem_capacity_bytes)
    except Exception:
        # Hardware query unavailable (old jax / non-TPU tracing): assume the
        # smallest production size (v7x, 64 MiB) so tiling stays conservative.
        return 64 * 1024 * 1024


@functools.lru_cache(maxsize=None)
def _single_buffer_consts_supported():
    """One-time capability probe: does pl.Buffered(1) (single-buffered constant
    operands) lower+compile on this jax/Mosaic version?

    Probing on a tiny throwaway kernel (instead of try/except around the real
    build) keeps genuine lowering errors of the real kernel visible and avoids
    silent double-buffering of the DFT matrices.
    """
    if not hasattr(pl, "Buffered"):
        return False

    def _probe(a_ref, o_ref):
        o_ref[...] = a_ref[...] + 1.0

    try:
        fn = pl.pallas_call(
            _probe,
            out_shape=jax.ShapeDtypeStruct((8, 128), jnp.float32),
            grid=(2,),
            in_specs=[pl.BlockSpec((8, 128), lambda i: (0, 0),
                                   pipeline_mode=pl.Buffered(1))],
            out_specs=pl.BlockSpec((8, 128), lambda i: (0, 0)),
        )
        arg = jax.ShapeDtypeStruct((8, 128), jnp.float32)
        jax.jit(fn).lower(arg).compile()
        return True
    except Exception:
        return False


def _pick_batch_tile(B, S, H, in_bytes, out_bytes, cbytes, const_bytes,
                     budget_bytes, fuse_stages):
    """Largest divisor Bt of B whose live VMEM footprint fits the budget.

    Footprint = double-buffered x block (original dtype) + double-buffered out
    block + resident DFT matrices + in-kernel intermediates. Bt is additionally
    capped so the grid keeps >= 2 steps, letting the 'parallel' batch axis shard
    across the two TensorCores on v7x.
    """
    best = 1
    for bt in range(1, B + 1):
        if B % bt:
            continue
        if B >= 2 and (B // bt) < 2:
            continue  # keep at least 2 grid steps (v7x megacore sharding)
        blocks = 2 * bt * S * H * (in_bytes + out_bytes)   # double-buffered x / out
        if fuse_stages:
            # per-b y_re/y_im (f32 + bf16 copies) + per-b z (f32)
            inter = S * H * (2 * 4 + 2 * cbytes + 4)
        else:
            # tile-wide y_re/y_im (f32 + bf16 copies) + per-b z (f32)
            inter = bt * S * H * (2 * 4 + 2 * cbytes) + S * H * 4
        if const_bytes + blocks + inter <= budget_bytes:
            best = bt
    return best


def _build_call(B, S, H, Bt, in_dtype, out_dtype, compute_dtype,
                fuse_stages, single_buffer_consts, vmem_limit_bytes):
    grid = (B // Bt,)

    const_kwargs = {}
    if single_buffer_consts:
        # Constant index_map across the grid -> double-buffering these operands
        # is pure VMEM waste; keep a single resident copy.
        const_kwargs = dict(pipeline_mode=pl.Buffered(1))

    in_specs = [
        pl.BlockSpec((Bt, S, H), lambda b: (b, 0, 0)),            # x batch tile
        pl.BlockSpec((H, H), lambda b: (0, 0), **const_kwargs),   # C_H
        pl.BlockSpec((H, H), lambda b: (0, 0), **const_kwargs),   # -Sin_H
        pl.BlockSpec((S, S), lambda b: (0, 0), **const_kwargs),   # C_S
        pl.BlockSpec((S, S), lambda b: (0, 0), **const_kwargs),   # +Sin_S
    ]
    out_specs = pl.BlockSpec((Bt, S, H), lambda b: (b, 0, 0))

    cbytes = np.dtype(compute_dtype).itemsize
    cost = pl.CostEstimate(
        flops=B * (4 * S * H * H + 4 * S * S * H),
        transcendentals=0,
        bytes_accessed=B * S * H * (np.dtype(in_dtype).itemsize
                                    + np.dtype(out_dtype).itemsize)
        + 2 * (S * S + H * H) * cbytes,
    )

    kernel = functools.partial(_fourier_mixer_kernel, fuse_stages=fuse_stages)

    return pl.pallas_call(
        kernel,
        out_shape=jax.ShapeDtypeStruct((B, S, H), out_dtype),
        grid_spec=pltpu.PrefetchScalarGridSpec(
            num_scalar_prefetch=0,
            grid=grid,
            in_specs=in_specs,
            out_specs=out_specs,
        ),
        compiler_params=pltpu.CompilerParams(
            dimension_semantics=("parallel",),
            vmem_limit_bytes=vmem_limit_bytes,
        ),
        cost_estimate=cost,
    )


def fourier_mixer(x, compute_dtype=jnp.bfloat16):
    """FNet Fourier mixing: real part of ortho FFT over dim=-1 then dim=-2.

    x: (B, S, H) real array. Returns the same shape and dtype as x.

    Notes:
      * MXU operands are bf16 with f32 accumulation; DFT matrices and the
        intermediate y_re/y_im recast are bf16, giving ~0.5-1% relative error
        (documented accuracy envelope; keep an f32 stage-2 path if stricter
        tolerances are needed downstream).
      * For peak performance S should be a multiple of 16 (bf16 sublanes) and H
        a multiple of 128 (lanes); other shapes are correct but may incur
        in-kernel relayouts / masked stores.
    """
    B, S, H = x.shape
    in_dtype = x.dtype
    out_dtype = x.dtype

    dname = np.dtype(compute_dtype).name
    ch, sh = _dft_mats(H, dname, -1.0)   # Re / Im of the ortho DFT matrix (hidden dim)
    cs, ss = _dft_mats(S, dname, +1.0)   # cos / +sin (sequence dim) -> stage 2 is dot+dot

    cbytes = np.dtype(compute_dtype).itemsize
    in_bytes = np.dtype(in_dtype).itemsize
    out_bytes = np.dtype(out_dtype).itemsize

    single_buffer_consts = _single_buffer_consts_supported()
    const_mult = 1 if single_buffer_consts else 2
    const_bytes = const_mult * 2 * (S * S + H * H) * cbytes

    capacity = _vmem_capacity_bytes()
    vmem_limit = min(int(capacity * 0.8), 100 * 1024 * 1024)  # ~100 MiB v5e/v6e, ~51 MiB v7x
    budget = int(vmem_limit * 0.85)                           # headroom for compiler scratch

    # Per-batch-element fusion once S alone fills the MXU rows; below that keep
    # the tall (Bt*S, H) stage-1 matmul.
    fuse_stages = S >= 256

    Bt = _pick_batch_tile(B, S, H, in_bytes, out_bytes, cbytes, const_bytes,
                          budget, fuse_stages)

    fn = _build_call(B, S, H, Bt, in_dtype, out_dtype, compute_dtype,
                     fuse_stages, single_buffer_consts, vmem_limit)
    return fn(x, ch, sh, cs, ss)
    # TODO(synk): for S or H >= ~2048 (where the bf16 (S,S)/(H,H) pairs alone
    # blow v7x's 64 MiB VMEM) add a K-tiled grid axis over the contraction
    # (panel-blocked DFT matrices, "arbitrary" semantics, f32 VMEM accumulator
    # with pl.when init/finalize) instead of whole-matrix operands.


if __name__ == "__main__":
    key = jax.random.PRNGKey(0)
    B, S, H = 2, 8, 32
    x = jax.random.normal(key, (B, S, H), dtype=jnp.float32)

    out = fourier_mixer(x)
    out = jax.block_until_ready(out)

    # Reference: exact module semantics via jnp.fft.
    ref = jnp.fft.fft(x, axis=-1, norm="ortho")
    ref = jnp.fft.fft(ref, axis=-2, norm="ortho")
    ref = jnp.real(ref)

    # Tolerance sized for bf16 MXU operands with f32 accumulation.
    np.testing.assert_allclose(np.asarray(out), np.asarray(ref),
                               rtol=3e-2, atol=3e-2)
    print("KERNEL_OK")
</pallas_src>

<mosaic_0001>
module attributes {stable_mosaic.version = 11 : i64} {
  func.func @_fourier_mixer_kernel(%arg0: i32, %arg1: memref<1x8x32xf32, #tpu.memory_space<vmem>>, %arg2: memref<32x32xbf16, #tpu.memory_space<vmem>>, %arg3: memref<32x32xbf16, #tpu.memory_space<vmem>>, %arg4: memref<8x8xbf16, #tpu.memory_space<vmem>>, %arg5: memref<8x8xbf16, #tpu.memory_space<vmem>>, %arg6: memref<1x8x32xf32, #tpu.memory_space<vmem>>) attributes {dimension_semantics = [#tpu.dimension_semantics<parallel>], iteration_bounds = array<i64: 2>, scalar_prefetch = 0 : i64, scratch_operands = 0 : i64, tpu.core_type = #tpu.core_type<tc>, window_params = [{transform_indices = @transform_0, window_bounds = array<i64: 1, 8, 32>}, {pipeline_mode = #tpu.pipeline_mode<synchronous>, transform_indices = @transform_1, window_bounds = array<i64: 32, 32>}, {pipeline_mode = #tpu.pipeline_mode<synchronous>, transform_indices = @transform_2, window_bounds = array<i64: 32, 32>}, {pipeline_mode = #tpu.pipeline_mode<synchronous>, transform_indices = @transform_3, window_bounds = array<i64: 8, 8>}, {pipeline_mode = #tpu.pipeline_mode<synchronous>, transform_indices = @transform_4, window_bounds = array<i64: 8, 8>}, {transform_indices = @transform_5, window_bounds = array<i64: 1, 8, 32>}]} {
    %c0 = arith.constant 0 : index
    %c0_0 = arith.constant 0 : index
    %0 = vector.load %arg2[%c0, %c0_0] : memref<32x32xbf16, #tpu.memory_space<vmem>>, vector<32x32xbf16>
    %c0_1 = arith.constant 0 : index
    %c0_2 = arith.constant 0 : index
    %1 = vector.load %arg3[%c0_1, %c0_2] : memref<32x32xbf16, #tpu.memory_space<vmem>>, vector<32x32xbf16>
    %c0_3 = arith.constant 0 : index
    %c0_4 = arith.constant 0 : index
    %2 = vector.load %arg4[%c0_3, %c0_4] : memref<8x8xbf16, #tpu.memory_space<vmem>>, vector<8x8xbf16>
    %c0_5 = arith.constant 0 : index
    %c0_6 = arith.constant 0 : index
    %3 = vector.load %arg5[%c0_5, %c0_6] : memref<8x8xbf16, #tpu.memory_space<vmem>>, vector<8x8xbf16>
    %c0_7 = arith.constant 0 : index
    %c0_8 = arith.constant 0 : index
    %c0_9 = arith.constant 0 : index
    %4 = vector.load %arg1[%c0_7, %c0_8, %c0_9] : memref<1x8x32xf32, #tpu.memory_space<vmem>>, vector<1x8x32xf32>
    %5 = arith.truncf %4 : vector<1x8x32xf32> to vector<1x8x32xbf16>
    %6 = vector.shape_cast %5 : vector<1x8x32xbf16> to vector<8x32xbf16>
    %cst = arith.constant dense<0.000000e+00> : vector<8x32xf32>
    %7 = tpu.matmul %6, %0, %cst {dimension_numbers = #tpu.dot_dimension_numbers<[1], [0], [0], [1], [0, 0, 1, 1], [], []>} : vector<8x32xbf16>, vector<32x32xbf16>, vector<8x32xf32> -> vector<8x32xf32>
    %8 = arith.truncf %7 : vector<8x32xf32> to vector<8x32xbf16>
    %cst_10 = arith.constant dense<0.000000e+00> : vector<8x32xf32>
    %9 = tpu.matmul %6, %1, %cst_10 {dimension_numbers = #tpu.dot_dimension_numbers<[1], [0], [0], [1], [0, 0, 1, 1], [], []>} : vector<8x32xbf16>, vector<32x32xbf16>, vector<8x32xf32> -> vector<8x32xf32>
    %10 = arith.truncf %9 : vector<8x32xf32> to vector<8x32xbf16>
    %cst_11 = arith.constant dense<0.000000e+00> : vector<8x32xf32>
    %11 = tpu.matmul %2, %8, %cst_11 {dimension_numbers = #tpu.dot_dimension_numbers<[1], [0], [0], [1], [0, 0, 1, 1], [], []>} : vector<8x8xbf16>, vector<8x32xbf16>, vector<8x32xf32> -> vector<8x32xf32>
    %cst_12 = arith.constant dense<0.000000e+00> : vector<8x32xf32>
    %12 = tpu.matmul %3, %10, %cst_12 {dimension_numbers = #tpu.dot_dimension_numbers<[1], [0], [0], [1], [0, 0, 1, 1], [], []>} : vector<8x8xbf16>, vector<8x32xbf16>, vector<8x32xf32> -> vector<8x32xf32>
    %13 = arith.addf %11, %12 : vector<8x32xf32>
    %c0_13 = arith.constant 0 : index
    %c0_14 = arith.constant 0 : index
    %c0_15 = arith.constant 0 : index
    %14 = vector.load %arg6[%c0_13, %c0_14, %c0_15] : memref<1x8x32xf32, #tpu.memory_space<vmem>>, vector<1x8x32xf32>
    %15 = vector.shape_cast %14 : vector<1x8x32xf32> to vector<8x32xf32>
    %16 = vector.shape_cast %13 : vector<8x32xf32> to vector<1x8x32xf32>
    tpu.vector_store %arg6[%c0_13, %c0_14, %c0_15], %16 {strides = array<i32>} : memref<1x8x32xf32, #tpu.memory_space<vmem>>, vector<1x8x32xf32>,
    return
  }
  func.func @transform_0(%arg0: i32) -> (i32, i32, i32) {
    %c0_i32 = arith.constant 0 : i32
    %c0_i32_0 = arith.constant 0 : i32
    %c0_i32_1 = arith.constant 0 : i32
    return %arg0, %c0_i32, %c0_i32_0 : i32, i32, i32
  }
  func.func @transform_1(%arg0: i32) -> (i32, i32) {
    %c0_i32 = arith.constant 0 : i32
    %c0_i32_0 = arith.constant 0 : i32
    %c0_i32_1 = arith.constant 0 : i32
    return %c0_i32, %c0_i32_0 : i32, i32
  }
  func.func @transform_2(%arg0: i32) -> (i32, i32) {
    %c0_i32 = arith.constant 0 : i32
    %c0_i32_0 = arith.constant 0 : i32
    %c0_i32_1 = arith.constant 0 : i32
    return %c0_i32, %c0_i32_0 : i32, i32
  }
  func.func @transform_3(%arg0: i32) -> (i32, i32) {
    %c0_i32 = arith.constant 0 : i32
    %c0_i32_0 = arith.constant 0 : i32
    %c0_i32_1 = arith.constant 0 : i32
    return %c0_i32, %c0_i32_0 : i32, i32
  }
  func.func @transform_4(%arg0: i32) -> (i32, i32) {
    %c0_i32 = arith.constant 0 : i32
    %c0_i32_0 = arith.constant 0 : i32
    %c0_i32_1 = arith.constant 0 : i32
    return %c0_i32, %c0_i32_0 : i32, i32
  }
  func.func @transform_5(%arg0: i32) -> (i32, i32, i32) {
    %c0_i32 = arith.constant 0 : i32
    %c0_i32_0 = arith.constant 0 : i32
    %c0_i32_1 = arith.constant 0 : i32
    return %arg0, %c0_i32, %c0_i32_0 : i32, i32, i32
  }
}

</mosaic_0001>

<bundles_post_ra>
// kernel: tpu_custom_call.1
= control target key start
LH: loop header
LB: loop body
LE: loop exit
PB: predicated region body
PF: predicated region fallthrough
CT: control target
= control target key end

     0   :  { %10 = vsyncpa [#allocation3], 0  ;;  %s1184_s0 = inlined_call_operand.hbm [shape: f32[2,8,32], index: 0, kind: input, shape index: {}]   ;;  %s1185_s1 = inlined_call_operand.hbm [shape: bf16[32,32], index: 1, kind: input, shape index: {}]   ;;  %s1186_s2 = inlined_call_operand.hbm [shape: bf16[32,32], index: 2, kind: input, shape index: {}]   ;;  %s1187_s3 = inlined_call_operand.vmem [shape: bf16[8,8], index: 3, kind: input, shape index: {}]   ;;  %s1188_s4 = inlined_call_operand.hbm [shape: bf16[8,8], index: 4, kind: input, shape index: {}]   ;;  %s1189_s5 = inlined_call_operand.hbm [shape: f32[2,8,32], index: 5, kind: output, shape index: {}]  }
   0x1   :  { %12 = vsyncpa [#allocation3 + $0x1], 0 }
   0x2   :  { %13 = vsyncpa [#allocation6], 0 }
   0x3   :  { %14 = vsyncpa [#allocation9], 0 }
   0x4   :  { %15 = vsyncpa [#allocation4], 0 }
   0x5   :  { %17 = vsyncpa [#allocation4 + $0x1], 0  ;;  %s981_s18 = smov 0   ;;  %s983_s19 = smov 0  }
   0x6   :  { %s985_s20 = smov 0   ;;  %s987_s21 = smov 0  }
   0x7 LB: > { %s1002_s22 = sadd.s32 4294967295, %s940_s21   ;;  %s613_s23 = sadd.s32 4294967294, %s940_s21   ;;  %s940_s21 = sphi %s987_s21, %s1213_s21   ;;  %s936_s20 = sphi %s985_s20, %s1212_s20   ;;  %s932_s19 = sphi %s983_s19, %s1211_s19   ;;  %s928_s18 = sphi %s981_s18, %s1210_s18  }
   0x8   : > { %p43_p0 = scmp.ne.s32.totalorder %s932_s19, %s928_s18  ;;  %p1190_p1 = scmp.eq.s32.totalorder %s1002_s22, 0 }
   0x9   : > { %p157_p3 = scmp.eq.s32.totalorder %s613_s23, 1  ;;  %p614_p5 = scmp.ge.s32.totalorder %s940_s21, 1 }
   0xa   : > { %p1011_p4 = por %p1190_p1, %p43_p0  ;;  %p164_p7 = scmp.lt.s32.totalorder %s940_s21, 3 }
   0xb   : > { %p1016_p6 = por %p157_p3, %p43_p0  ;;  %s942_s27 = smov [#allocation5]  }
   0xc   : > { %s1194_s24 = scalar_select %p1011_p4, 1, 0 }
   0xd   : > { %s1195_s25 = scalar_select %p1016_p6, 1, 0 }
   0xe   : > { %p1021_p8 = pnand %p614_p5, %p164_p7  ;;  %s176_s28 = sshll.u32 %s942_s27, 4  ;;  %s177_s28 = int_to_ptr.vmem [resolvable:$true] %s176_s28 }
   0xf   : > { %s943_s30 = smov [#allocation7]   ;;  %s944_s7 = smov [#allocation8]  }
  0x10   : > { %s1196_s26 = scalar_select %p1021_p8, 1, 0 }
  0x11   : > { %p693_p9 = pneg %p1021_p8  ;;  %s189_s6 = sshll.u32 %s943_s30, 4  ;;  %s190_s6 = int_to_ptr.vmem [resolvable:$true] %s189_s6 }
  0x12   : > { %s206_s8 = sshll.u32 %s944_s7, 4  ;;  %s773_s9 = scalar_lea.vmem %s177_s28, 256  ;;  %s207_s8 = int_to_ptr.vmem [resolvable:$true] %s206_s8 }
  0x13   : > { %p1030_p11 = pnand %p693_p9, %p1190_p1  ;;  %p774_p13 = scmp.ne.s32.totalorder %s177_s28, %s773_s9 }
  0x14   : > { %p781_p5 = scmp.lt.s32.totalorder %s177_s28, %s177_s28  ;;  %p782_p7 = scmp.lt.s32.totalorder %s773_s9, %s773_s9 }
  0x15   : > { %p764_p12 = pneg %p1030_p11 }
  0x16   : > { %p783_p9 = por %p782_p7, %p781_p5 }
  0x17   : > { %p776_p0 = pnand %p774_p13, %p764_p12 }
  0x19   : > { %p777_p3 = pneg %p776_p0 }
  0x1b   : > { %p784_p10 = pnand %p783_p9, %p777_p3 }
  0x1d   : > { %787 = shalt.err (!%p784_p10)
}
  0x1e   : > { %s945_s10 = smov 64   ;;  %s946_s11 = smov 4  }
  0x1f   : > { %696 = dma.hbm_to_vmem [thread:$0]  (!%p1030_p11), %s1185_s1, 256, %s177_s28, [#allocation6], %s945_s10, %s945_s10, %s946_s11  }
  0x20   : > { %s799_s14 = scalar_lea.vmem %s190_s6, 256  ;;  %p807_p2 = scmp.lt.s32.totalorder %s190_s6, %s190_s6 }
  0x21   : > { %p800_p1 = scmp.ne.s32.totalorder %s190_s6, %s799_s14  ;;  %p808_p6 = scmp.lt.s32.totalorder %s799_s14, %s799_s14 }
  0x23   : > { %p802_p13 = pnand %p800_p1, %p764_p12  ;;  %p809_p5 = por %p808_p6, %p807_p2 }
  0x25   : > { %p803_p0 = pneg %p802_p13 }
  0x27   : > { %p810_p3 = pnand %p809_p5, %p803_p0 }
  0x29   : > { %813 = shalt.err (!%p810_p3)
}
  0x2a   : > { %699 = dma.hbm_to_vmem [thread:$0]  (!%p1030_p11), %s1186_s2, 256, %s190_s6, [#allocation6], %s945_s10, %s945_s10, %s946_s11  }
  0x2b   : > { %s825_s17 = scalar_lea.vmem %s207_s8, 64  ;;  %p833_p9 = scmp.lt.s32.totalorder %s207_s8, %s207_s8 }
  0x2c   : > { %p826_p10 = scmp.ne.s32.totalorder %s207_s8, %s825_s17  ;;  %p834_p13 = scmp.lt.s32.totalorder %s825_s17, %s825_s17 }
  0x2e   : > { %p828_p7 = pnand %p826_p10, %p764_p12  ;;  %p835_p4 = por %p834_p13, %p833_p9 }
  0x30   : > { %p829_p1 = pneg %p828_p7 }
  0x32   : > { %p836_p2 = pnand %p835_p4, %p829_p1 }
  0x34   : > { %839 = shalt.err (!%p836_p2)
}
  0x35   : > { %702 = dma.hbm_to_vmem [thread:$0]  (!%p1030_p11), %s1188_s4, 64, %s207_s8, [#allocation9]  }
  0x36   : > { %s1061_s28 = sadd.s32 1, %s940_s21   ;;  %s30_s29 = sadd.s32 1, %s936_s20 }
  0x37   : > { %s27_s30 = ssub.s32 %s940_s21, %s1061_s28  ;;  %p37_p6 = scmp.ne.s32.totalorder %s936_s20, %s932_s19 }
  0x38   : > { %p28_p4 = scmp.eq.s32.totalorder %s27_s30, 0  ;;  %p38_p12 = scmp.eq.s32.totalorder %s940_s21, 0 }
  0x39   : > { %p714_p0 = scmp.lt.s32.totalorder %s940_s21, 2  ;;  %p1198_p3 = scmp.eq.s32.totalorder %s1002_s22, 1 }
  0x3a   : > { %s1071_s6 = scalar_select %p28_p4, %s936_s20, %s30_s29  }
  0x3b   : > { %p39_p5 = por %p38_p12, %p37_p6  ;;  %p1075_p10 = por %p1198_p3, %p37_p6 }
  0x3c   : > { %s217_s9 = sand.u32 1, %s936_s20   ;;  %s620_s10 = sshll.u32 %s940_s21, 7 }
  0x3d   : > { %s1199_s7 = scalar_select %p1075_p10, 1, 0 }
  0x3e   : > { %s619_s8 = sshll.u32 %s217_s9, 3  ;;  %s1084_s13 = scalar_lea.hbm %s1184_s0, %s620_s10 }
  0x3f   : > { %s221_s14 = scalar_lea.vmem [#allocation2], %s619_s8  ;;  %p1086_p11 = pnand %p714_p0, %p39_p5 }
  0x40   : > { %s228_s15 = sshll.u32 %s221_s14, 4  ;;  %s218_s17 = scalar_lea.sflag [#allocation3], %s217_s9  ;;  %s229_s15 = int_to_ptr.vmem [resolvable:$true] %s228_s15 }
  0x41   : > { %s840_s23 = scalar_lea.hbm %s1084_s13, 128  ;;  %p842_p1 = pneg %p1086_p11 }
  0x42   : > { %p841_p7 = scmp.ne.s32.totalorder %s1084_s13, %s840_s23  ;;  %s845_s29 = scalar_lea.hbm %s1184_s0, 256 }
  0x43   : > { %p846_p2 = scmp.lt.s32.totalorder %s1084_s13, %s1184_s0  ;;  %p847_p4 = scmp.lt.s32.totalorder %s845_s29, %s840_s23 }
  0x44   : > { %p843_p9 = pnand %p842_p1, %p841_p7 }
  0x45   : > { %p848_p6 = por %p847_p4, %p846_p2 }
  0x46   : > { %p844_p13 = pneg %p843_p9 }
  0x48   : > { %p849_p12 = pnand %p848_p6, %p844_p13 }
  0x4a   : > { %852 = shalt.err (!%p849_p12)
}
  0x4b   : > { %s853_s11 = scalar_lea.vmem %s229_s15, 128  ;;  %s947_s9 = smov [#allocation2]  }
  0x4c   : > { %p854_p0 = scmp.ne.s32.totalorder %s229_s15, %s853_s11  ;;  %s858_s12 = sshll.u32 %s947_s9, 4  ;;  %s859_s12 = int_to_ptr.vmem [resolvable:$false] %s858_s12 }
  0x4d   : > { %s860_s14 = scalar_lea.vmem %s859_s12, 256  ;;  %p861_p7 = scmp.lt.s32.totalorder %s229_s15, %s859_s12 }
  0x4e   : > { %p856_p5 = pnand %p854_p0, %p842_p1  ;;  %p862_p9 = scmp.lt.s32.totalorder %s860_s14, %s853_s11 }
  0x50   : > { %p857_p3 = pneg %p856_p5  ;;  %p863_p10 = por %p862_p9, %p861_p7 }
  0x52   : > { %p864_p8 = pnand %p863_p10, %p857_p3 }
  0x54   : > { %867 = shalt.err (!%p864_p8)
}
  0x55   : > { %706 = dma.hbm_to_vmem [thread:$0]  (!%p1086_p11), %s1084_s13, 128, %s229_s15, %s218_s17  }
  0x56   : > { %p1201_p13 = scmp.ne.s32.totalorder %s1196_s26, 0 }
  0x57   : > { %s1107_s23 = sand.u32 (!%p1201_p13), 1, %s932_s19   ;;  %p1202_p10 = scmp.ne.s32.totalorder (!%p1201_p13), %s1194_s24, 0 }
  0x58   : > { %237 = sbr.rel (%p1201_p13) target bundleno = 518 (0x206), region = 40  ;;  %s622_s27 = sshll.u32 (!%p1201_p13), %s1107_s23, 3 }
  0x59   : > { %s240_s30 = scalar_lea.sflag (!%p1201_p13), [#allocation3], %s1107_s23  ;;  %s243_s29 = scalar_lea.vmem (!%p1201_p13), [#allocation2], %s622_s27 }
  0x5d   : > { %911 = dma.done.wait (%p1202_p10), %s240_s30, 128  }
  0x5e   : > { %913 = vsyncadd (%p1202_p10), %s240_s30, 4294967168  ;;  %p1203_p8 = scmp.eq.s32.totalorder %s1002_s22, 0 }
  0x60   : > { %915 = dma.done.wait (%p1203_p8), [#allocation6], 512   ;;  %p1204_p11 = pmov %p1203_p8 }
  0x61   : > { %p1205_p1 = pmov %p1203_p8 }
  0x62   : > { %917 = vsyncadd (%p1204_p11), [#allocation6], 4294966784 }
  0x63   : > { %919 = dma.done.wait (%p1205_p1), [#allocation9], 64   ;;  %p1206_p2 = pmov %p1205_p1 }
  0x64   : > { %v948_v0 = vmov 0.0   ;;  %vm949_vm0 = vmmov 0   ;;  %v758_v1 = vld [vmem:[#allocation5 + $0x8] sm:$0xff]   ;;  %v759_v2 = vld [vmem:[#allocation7 + $0x8] sm:$0xff]   ;;  %v760_v3 = vld [vmem:[#allocation5] sm:$0xff]   ;;  %vm307_vm1 = vcmask 261120  }
  0x65   : > { %921 = vsyncadd (%p1206_p2), [#allocation9], 4294967232  ;;  %649 = vmatprep.subr.bf16.mxu0 %v948_v0  ;;  %657 = vmatprep.subr.bf16.mxu1 %v948_v0  ;;  %v761_v4 = vld [vmem:[#allocation7] sm:$0xff]   ;;  %vm409_vm2 = vcmask 1043456   ;;  %vm405_vm3 = vcmask 64512   ;;  %s636_s13 = sshll.u32 %s1002_s22, 7 }
  0x66   : > { %653 = vmatprep.mubr.msk.bf16.mxu0 %vm949_vm0, %v948_v0  ;;  %661 = vmatprep.mubr.msk.bf16.mxu1 %vm949_vm0, %v948_v0  ;;  %v293_v5 = vld [vmem:[%s243_s29] sm:$0xff]  ;;  %v292_v18 = vld [vmem:[#allocation8] sm:$0xf]  ;;  %s281_s15 = scalar_lea.vmem [#allocation10], %s622_s27  ;;  %s1140_s8 = scalar_lea.hbm %s1189_s5, %s636_s13 }
  0x67   : > { %650 = vmatpush3.bf16.msra.mxu0 %v758_v1  ;;  %658 = vmatpush3.bf16.msra.mxu1 %v759_v2  ;;  %v294_v6 = vpack.c.bf16 %v293_v5, %v293_v5  ;;  %v291_v16 = vld [vmem:[%s1187_s3] sm:$0xf]  ;;  %s514_s16 = sshll.u32 %s281_s15, 4  ;;  %s501_s22 = scalar_lea.sflag [#allocation4], %s1107_s23  ;;  %s1142_s16 = int_to_ptr.vmem [resolvable:$true] %s514_s16 }
  0x68   : > { %651 = vmatprep.subr.bf16.mxu0 %v948_v0  ;;  %659 = vmatprep.subr.bf16.mxu1 %v948_v0  ;;  %s868_s11 = scalar_lea.vmem %s1142_s16, 128  ;;  %p1207_p6 = scmp.ne.s32.totalorder %s1199_s7, 0 }
  0x69   : > { %p869_p4 = scmp.ne.s32.totalorder %s1142_s16, %s868_s11  ;;  %s950_s9 = smov [#allocation10]  }
  0x6a   : > { %s872_s12 = sshll.u32 %s950_s9, 4  ;;  %s873_s12 = int_to_ptr.vmem [resolvable:$false] %s872_s12 }
  0x6b   : > { %652 = vmatpush3.bf16.msra.mxu0 %v760_v3  ;;  %660 = vmatpush3.bf16.msra.mxu1 %v761_v4  ;;  %p870_p12 = pnand %p869_p4, %p1207_p6  ;;  %s874_s14 = scalar_lea.vmem %s873_s12, 256 }
  0x6c   : > { %665 = vmatprep.subr.bf16.mxu0 %v948_v0  ;;  %671 = vmatprep.subr.bf16.mxu1 %v948_v0  ;;  %p875_p5 = scmp.lt.s32.totalorder %s1142_s16, %s873_s12  ;;  %p876_p3 = scmp.lt.s32.totalorder %s874_s14, %s868_s11 }
  0x6d   : > { %p871_p0 = pneg %p870_p12 }
  0x6e   : > { %654 = vmatmul.mubr.msk.bf16.vlgmr.msra.gmra.mxu0 %vm307_vm1, %v294_v6  ;;  %662 = vmatmul.mubr.msk.bf16.vlgmr.msra.gmra.mxu1 %vm307_vm1, %v294_v6  ;;  %p877_p7 = por %p876_p3, %p875_p5 }
  0x6f   : > { %667 = vmatprep.mubr.msk.bf16.mxu0 %vm949_vm0, %v948_v0  ;;  %673 = vmatprep.mubr.msk.bf16.mxu1 %vm949_vm0, %v948_v0 }
  0x70   : > { %p878_p9 = pnand %p877_p7, %p871_p0 }
 0x12e   : > { %v345_v7 = vpop.f32.mrf.mxu0  ;;  %v398_v9 = vpop.f32.mrf.mxu1 }
 0x12f   : > { %v351_v8 = vpack.c.bf16 %v345_v7, %v345_v7  ;;  %v404_v10 = vpack.c.bf16 %v398_v9, %v398_v9 }
 0x130   : > { %v655_v11 = vpop.f32.mrf.mxu0  ;;  %v663_v13 = vpop.f32.mrf.mxu1 }
 0x131   : > { %v457_v12 = vsel %vm409_vm2, %v351_v8, 0  ;;  %v411_v14 = vsel %vm409_vm2, %v404_v10, 0 }
 0x132   : > { %v348_v15 = vpop.f32.mrf.mxu0  ;;  %672 = vmatpush3.bf16.msra.mxu1 %v457_v12  ;;  %v401_v17 = vpop.f32.mrf.mxu1  ;;  %666 = vmatpush3.bf16.msra.mxu0 %v411_v14 }
 0x134   : > { %v656_v19 = vpop.f32.mrf.mxu0  ;;  %v664_v20 = vpop.f32.mrf.mxu1 }
 0x135   : > { %674 = vmatmul.mubr.msk.bf16.vlgmr.msra.gmra.mxu1 %vm405_vm3, %v291_v16  ;;  %668 = vmatmul.mubr.msk.bf16.vlgmr.msra.gmra.mxu0 %vm405_vm3, %v292_v18 }
 0x1f5   : > { %v493_v21 = vpop.f32.mrf.mxu1  ;;  %v447_v22 = vpop.f32.mrf.mxu0 }
 0x1f6   : > { %v494_v23 = vadd.f32 %v493_v21, %v447_v22 }
 0x1f7   : > { %v675_v24 = vpop.f32.mrf.mxu1  ;;  %v669_v25 = vpop.f32.mrf.mxu0 }
 0x1f8   : > { %499 = vst.msk [vmem:[%s281_s15] sm:$0xff] %vm307_vm1, %v494_v23 }
 0x1f9   : > { %v496_v26 = vpop.f32.mrf.mxu1  ;;  %v450_v27 = vpop.f32.mrf.mxu0 }
 0x1fa   : > { %881 = shalt.err (!%p878_p9)
}
 0x1fb   : > { %s882_s27 = scalar_lea.hbm %s1140_s8, 128  ;;  %s886_s29 = scalar_lea.hbm %s1189_s5, 256 }
 0x1fc   : > { %p883_p13 = scmp.ne.s32.totalorder %s1140_s8, %s882_s27  ;;  %p887_p11 = scmp.lt.s32.totalorder %s1140_s8, %s1189_s5 }
 0x1fd   : > { %p888_p1 = scmp.lt.s32.totalorder %s886_s29, %s882_s27 }
 0x1fe   : > { %p884_p10 = pnand %p883_p13, %p1207_p6 }
 0x1ff   : > { %p889_p2 = por %p888_p1, %p887_p11 }
 0x200   : > { %p885_p8 = pneg %p884_p10 }
 0x202   : > { %p890_p4 = pnand %p889_p2, %p885_p8 }
 0x204   : > { %893 = shalt.err (!%p890_p4)
}
 0x205   : > { %691 = dma.vmem_to_hbm [thread:$0]  (%p1207_p6), %s1142_s16, 128, %s1140_s8, %s501_s22   ;;  %v676_v28 = vpop.f32.mrf.mxu1  ;;  %v670_v29 = vpop.f32.mrf.mxu0 }
 0x206 PF: > { %s526_s13 = sand.u32 1, %s928_s18   ;;  %p1208_p12 = scmp.ne.s32.totalorder %s1195_s25, 0 }
 0x207   : > { %p1209_p0 = scmp.ge.s32.totalorder %s940_s21, 2  ;;  %s527_s15 = scalar_lea.sflag [#allocation4], %s526_s13 }
 0x209   : > { %p708_p5 = pnand %p1209_p0, %p1208_p12 }
 0x20b   : > { %p709_p3 = pneg %p708_p5 }
 0x20d   : > { %923 = dma.done.wait (%p709_p3), %s527_s15, 128  }
 0x20e   : > { %925 = vsyncadd (%p709_p3), %s527_s15, 4294967168  ;;  %p20_p6 = scmp.ge.s32.totalorder %s1061_s28, 4   ;;  %s1210_s18 = smov %s932_s19 }
 0x20f   : > { %s1211_s19 = smov %s936_s20  ;;  %s1212_s20 = smov %s1071_s6 }
 0x210   : > { %s1213_s21 = smov %s1061_s28  ;;  %22 = sbr.rel (!%p20_p6) target bundleno = 7 (0x7), region = 97 }
 0x215   :  { %532 = vsyncpa [#allocation3], 1 }
 0x216   :  { %534 = vsyncpa [#allocation3 + $0x1], 1 }
 0x217   :  { %535 = vsyncpa [#allocation6], 1 }
 0x218   :  { %536 = vsyncpa [#allocation9], 1 }
 0x219   :  { %537 = vsyncpa [#allocation4], 1 }
 0x21a   :  { %539 = vsyncpa [#allocation4 + $0x1], 1 }

</bundles_post_ra>
